<compile_context>
chip_gen: v6e
topology: v6e:2x2x1
jax: 0.10.0
libtpu: 0.0.40
codegen_flags: <defaults>
</compile_context>

<pallas_src>
import jax
import jax.numpy as jnp
from jax.experimental import pallas as pl
from jax.experimental.pallas import tpu as pltpu


def _pick_b_tile(N, Cin, Cout, HWp, budget_bytes):
    """Largest batch tile (divisor of N) whose f32 working set fits the budget,
    preferring sublane-tile-friendly (8-aligned) channel-row counts."""
    per_image = (6 * Cin + 3 * Cout) * HWp * 4  # rough in-kernel f32 bytes/image
    cap = max(1, budget_bytes // max(per_image, 1))
    divisors = [d for d in range(1, N + 1) if N % d == 0]
    good = [d for d in divisors
            if d <= cap and (d == N or ((d * Cin) % 8 == 0 and (d * Cout) % 8 == 0))]
    if good:
        return max(good)
    if per_image * N <= 4 * budget_bytes:
        return N
    fit = [d for d in divisors if d <= cap]
    return max(fit) if fit else 1


def _make_kernel(HWp, W, BCin, BCout, use_mxu):
    # Non-center taps: (tap index t = kh*3+kw, flat shift s = (kh-1)*W + (kw-1)).
    taps = [(kh * 3 + kw, (kh - 1) * W + (kw - 1))
            for kh in range(3) for kw in range(3) if not (kh == 1 and kw == 1)]

    def kernel(x_ref, wdw_ref, mask_ref, dwb_ref, wpw_ref, pwb_ref, o_ref):
        # x_ref:   (BCin, HWp)    B_TILE images, channels packed on sublanes
        # wdw_ref: (BCin, 9)      depthwise taps (BN scale folded, batch-tiled)
        # mask_ref:(9, HWp)       0/1 border-validity mask per tap
        # dwb_ref: (BCin, 1)      depthwise-branch folded BN bias
        # wpw_ref: (BCout, BCin)  block-diagonal pointwise weights (BN scale folded)
        # pwb_ref: (BCout, 1)     pointwise-branch folded BN bias
        # o_ref:   (BCout, HWp)
        x = x_ref[...].astype(jnp.float32)
        wdw = wdw_ref[...]        # hoisted: load once, slice the value per tap
        mask = mask_ref[...]      # hoisted

        # --- depthwise 3x3: center tap + 8 XLU lane-rolls with border masks ---
        acc = wdw[:, 4:5] * x                                 # center (no roll/mask)
        for t, s in taps:
            shifted = pltpu.roll(x, (-s) % HWp, axis=1)       # shifted[p] = x[p+s]
            acc = acc + wdw[:, t:t + 1] * (shifted * mask[t:t + 1, :])

        # --- folded-BN bias + ReLU (scale already inside wdw) ---
        mid = jnp.maximum(acc + dwb_ref[...], 0.0)            # (BCin, HWp) f32

        # --- pointwise 1x1 ---
        if use_mxu:
            # bf16 inputs, f32 accumulate: one MXU matmul for all B_TILE images.
            out = jnp.dot(wpw_ref[...].astype(jnp.bfloat16),
                          mid.astype(jnp.bfloat16),
                          preferred_element_type=jnp.float32)  # (BCout, HWp)
        else:
            # Tiny contraction: exact f32 VPU outer-product FMAs.
            wpw = wpw_ref[...]
            out = jnp.zeros((BCout, HWp), jnp.float32)
            for c in range(BCin):
                out = out + wpw[:, c:c + 1] * mid[c:c + 1, :]

        out = jnp.maximum(out + pwb_ref[...], 0.0)
        o_ref[...] = out.astype(o_ref.dtype)                   # lane-dense store

    return kernel


def dwconv_pallas(x_nchw, w_dw, dw_gamma, dw_beta, dw_mean, dw_var,
                  w_pw, pw_gamma, pw_beta, pw_mean, pw_var, eps=1e-5,
                  vmem_budget_bytes=8 * 1024 * 1024):
    N, Cin, H, W = x_nchw.shape
    Cout = w_pw.shape[0]
    HW = H * W
    f32 = jnp.float32

    # Lane axis padded to a multiple of 128 only when necessary (no-op here).
    HWp = ((HW + 127) // 128) * 128

    B_TILE = _pick_b_tile(N, Cin, Cout, HWp, vmem_budget_bytes)
    BCin, BCout = B_TILE * Cin, B_TILE * Cout
    use_mxu = BCin >= 8

    # NCHW kept; merging (N,Cin) and (H,W) is a free contiguous reshape.
    x2d = x_nchw.reshape(N * Cin, HW)
    if HWp != HW:
        x2d = jnp.pad(x2d, ((0, 0), (0, HWp - HW)))

    # Fold BN (eval mode) scale into the conv weights; keep only bias in-kernel.
    dw_s = dw_gamma.astype(f32) / jnp.sqrt(dw_var.astype(f32) + eps)
    dw_b = dw_beta.astype(f32) - dw_mean.astype(f32) * dw_s
    pw_s = pw_gamma.astype(f32) / jnp.sqrt(pw_var.astype(f32) + eps)
    pw_b = pw_beta.astype(f32) - pw_mean.astype(f32) * pw_s

    wdw = w_dw[:, 0, :, :].reshape(Cin, 9).astype(f32) * dw_s[:, None]   # (Cin, 9)
    wpw = w_pw[:, :, 0, 0].astype(f32) * pw_s[:, None]                    # (Cout, Cin)

    # Batch-tile per-channel params; block-diagonalise the pointwise weights so
    # one matmul covers all B_TILE images.
    wdw_t = jnp.tile(wdw, (B_TILE, 1))                          # (BCin, 9)
    dwb_t = jnp.tile(dw_b.reshape(Cin, 1), (B_TILE, 1))         # (BCin, 1)
    wpw_bd = jnp.kron(jnp.eye(B_TILE, dtype=f32), wpw)          # (BCout, BCin)
    pwb_t = jnp.tile(pw_b.reshape(Cout, 1), (B_TILE, 1))        # (BCout, 1)

    # Per-tap 0/1 validity masks (padding=1 without materialising padded images).
    rows = jnp.arange(H, dtype=jnp.int32).reshape(H, 1)
    cols = jnp.arange(W, dtype=jnp.int32).reshape(1, W)
    masks = []
    for kh in range(3):
        for kw in range(3):
            dh, dw = kh - 1, kw - 1
            m = ((rows + dh >= 0) & (rows + dh < H) &
                 (cols + dw >= 0) & (cols + dw < W))
            masks.append(m.reshape(HW))
    tap_mask = jnp.stack(masks, axis=0).astype(f32)             # (9, HW)
    if HWp != HW:
        tap_mask = jnp.pad(tap_mask, ((0, 0), (0, HWp - HW)))

    kernel = _make_kernel(HWp, W, BCin, BCout, use_mxu)

    itemsize = jnp.dtype(x_nchw.dtype).itemsize
    cost = pl.CostEstimate(
        flops=int(N * HWp * (27 * Cin + 2 * Cin * Cout * B_TILE)),
        transcendentals=0,
        bytes_accessed=int(N * Cin * HWp * itemsize + N * Cout * HWp * itemsize
                           + (BCin * 10 + BCout * (BCin + 1) + 9 * HWp) * 4),
    )

    block_bytes = (4 * BCin + 3 * BCout + 2 * 9) * HWp * 4
    vmem_limit = int(min(64 * 1024 * 1024, max(32 * 1024 * 1024, 4 * block_bytes)))

    out2d = pl.pallas_call(
        kernel,
        out_shape=jax.ShapeDtypeStruct((N * Cout, HWp), x_nchw.dtype),
        grid_spec=pltpu.PrefetchScalarGridSpec(
            num_scalar_prefetch=0,
            grid=(N // B_TILE,),
            in_specs=[
                pl.BlockSpec((BCin, HWp), lambda i: (i, 0)),     # x (B_TILE images)
                pl.BlockSpec((BCin, 9), lambda i: (0, 0)),       # depthwise taps
                pl.BlockSpec((9, HWp), lambda i: (0, 0)),        # tap masks
                pl.BlockSpec((BCin, 1), lambda i: (0, 0)),       # dw folded BN bias
                pl.BlockSpec((BCout, BCin), lambda i: (0, 0)),   # pointwise (block-diag)
                pl.BlockSpec((BCout, 1), lambda i: (0, 0)),      # pw folded BN bias
            ],
            out_specs=pl.BlockSpec((BCout, HWp), lambda i: (i, 0)),
        ),
        compiler_params=pltpu.CompilerParams(
            dimension_semantics=("parallel",),
            vmem_limit_bytes=vmem_limit),
        cost_estimate=cost,
    )(x2d, wdw_t, tap_mask, dwb_t, wpw_bd, pwb_t)

    out2d = out2d[:, :HW] if HWp != HW else out2d
    return out2d.reshape(N, Cout, H, W)


def dwconv_reference(x, w_dw, dw_gamma, dw_beta, dw_mean, dw_var,
                     w_pw, pw_gamma, pw_beta, pw_mean, pw_var, eps=1e-5):
    """Pure-JAX reference matching PyTorch DWConv.forward (eval-mode BN)."""
    Cin = x.shape[1]
    dw = jax.lax.conv_general_dilated(
        x, w_dw, window_strides=(1, 1), padding=((1, 1), (1, 1)),
        dimension_numbers=('NCHW', 'OIHW', 'NCHW'), feature_group_count=Cin)
    dw = (dw - dw_mean[None, :, None, None]) / jnp.sqrt(dw_var + eps)[None, :, None, None]
    dw = dw * dw_gamma[None, :, None, None] + dw_beta[None, :, None, None]
    dw = jnp.maximum(dw, 0.0)
    pw = jax.lax.conv_general_dilated(
        dw, w_pw, window_strides=(1, 1), padding='VALID',
        dimension_numbers=('NCHW', 'OIHW', 'NCHW'))
    pw = (pw - pw_mean[None, :, None, None]) / jnp.sqrt(pw_var + eps)[None, :, None, None]
    pw = pw * pw_gamma[None, :, None, None] + pw_beta[None, :, None, None]
    pw = jnp.maximum(pw, 0.0)
    return pw


if __name__ == "__main__":
    N, Cin, H, W = 2, 4, 16, 16
    Cout = 8

    key = jax.random.PRNGKey(0)
    kx, kdw, kpw, kg1, kb1, kg2, kb2 = jax.random.split(key, 7)

    x = jax.random.normal(kx, (N, Cin, H, W), dtype=jnp.float32)

    # Parameters (deterministic, synthetic).
    w_dw = jax.random.normal(kdw, (Cin, 1, 3, 3), dtype=jnp.float32) * 0.3
    w_pw = jax.random.normal(kpw, (Cout, Cin, 1, 1), dtype=jnp.float32) * 0.3
    dw_gamma = 1.0 + 0.1 * jax.random.normal(kg1, (Cin,), dtype=jnp.float32)
    dw_beta = 0.1 * jax.random.normal(kb1, (Cin,), dtype=jnp.float32)
    dw_mean = jnp.zeros((Cin,), jnp.float32)   # fresh BN running stats
    dw_var = jnp.ones((Cin,), jnp.float32)
    pw_gamma = 1.0 + 0.1 * jax.random.normal(kg2, (Cout,), dtype=jnp.float32)
    pw_beta = 0.1 * jax.random.normal(kb2, (Cout,), dtype=jnp.float32)
    pw_mean = jnp.zeros((Cout,), jnp.float32)
    pw_var = jnp.ones((Cout,), jnp.float32)

    out = dwconv_pallas(x, w_dw, dw_gamma, dw_beta, dw_mean, dw_var,
                        w_pw, pw_gamma, pw_beta, pw_mean, pw_var)
    out = jax.block_until_ready(out)

    ref = dwconv_reference(x, w_dw, dw_gamma, dw_beta, dw_mean, dw_var,
                           w_pw, pw_gamma, pw_beta, pw_mean, pw_var)
    ref = jax.block_until_ready(ref)

    assert out.shape == (N, Cout, H, W), out.shape
    # Pointwise conv now runs on the MXU with bf16 inputs / f32 accumulation
    # (per perf review), so the tolerance is set to bf16-appropriate levels.
    assert jnp.allclose(out, ref, rtol=3e-2, atol=3e-2), \
        f"max abs err {jnp.max(jnp.abs(out - ref))}"

    print("KERNEL_OK")
</pallas_src>

<mosaic_0001>
module attributes {stable_mosaic.version = 11 : i64} {
  func.func @kernel(%arg0: i32, %arg1: memref<8x256xf32, #tpu.memory_space<vmem>>, %arg2: memref<8x9xf32, #tpu.memory_space<vmem>>, %arg3: memref<9x256xf32, #tpu.memory_space<vmem>>, %arg4: memref<8x1xf32, #tpu.memory_space<vmem>>, %arg5: memref<16x8xf32, #tpu.memory_space<vmem>>, %arg6: memref<16x1xf32, #tpu.memory_space<vmem>>, %arg7: memref<16x256xf32, #tpu.memory_space<vmem>>) attributes {dimension_semantics = [#tpu.dimension_semantics<parallel>], iteration_bounds = array<i64: 1>, scalar_prefetch = 0 : i64, scratch_operands = 0 : i64, tpu.core_type = #tpu.core_type<tc>, window_params = [{transform_indices = @transform_0, window_bounds = array<i64: 8, 256>}, {pipeline_mode = #tpu.pipeline_mode<synchronous>, transform_indices = @transform_1, window_bounds = array<i64: 8, 9>}, {pipeline_mode = #tpu.pipeline_mode<synchronous>, transform_indices = @transform_2, window_bounds = array<i64: 9, 256>}, {pipeline_mode = #tpu.pipeline_mode<synchronous>, transform_indices = @transform_3, window_bounds = array<i64: 8, 1>}, {pipeline_mode = #tpu.pipeline_mode<synchronous>, transform_indices = @transform_4, window_bounds = array<i64: 16, 8>}, {pipeline_mode = #tpu.pipeline_mode<synchronous>, transform_indices = @transform_5, window_bounds = array<i64: 16, 1>}, {transform_indices = @transform_6, window_bounds = array<i64: 16, 256>}]} {
    %c0 = arith.constant 0 : index
    %c0_0 = arith.constant 0 : index
    %0 = vector.load %arg1[%c0, %c0_0] : memref<8x256xf32, #tpu.memory_space<vmem>>, vector<8x256xf32>
    %c0_1 = arith.constant 0 : index
    %c0_2 = arith.constant 0 : index
    %1 = vector.load %arg2[%c0_1, %c0_2] : memref<8x9xf32, #tpu.memory_space<vmem>>, vector<8x9xf32>
    %c0_3 = arith.constant 0 : index
    %c0_4 = arith.constant 0 : index
    %2 = vector.load %arg3[%c0_3, %c0_4] : memref<9x256xf32, #tpu.memory_space<vmem>>, vector<9x256xf32>
    %3 = vector.extract_strided_slice %1 {offsets = [0, 4], sizes = [8, 1], strides = [1, 1]} : vector<8x9xf32> to vector<8x1xf32>
    %4 = vector.broadcast %3 : vector<8x1xf32> to vector<8x256xf32>
    %5 = arith.mulf %4, %0 : vector<8x256xf32>
    %c17_i32 = arith.constant 17 : i32
    %6 = tpu.dynamic_rotate %0 by %c17_i32 dim 1 : vector<8x256xf32>, i32 -> vector<8x256xf32>
    %7 = vector.extract_strided_slice %1 {offsets = [0, 0], sizes = [8, 1], strides = [1, 1]} : vector<8x9xf32> to vector<8x1xf32>
    %8 = vector.extract_strided_slice %2 {offsets = [0, 0], sizes = [1, 256], strides = [1, 1]} : vector<9x256xf32> to vector<1x256xf32>
    %9 = vector.broadcast %8 : vector<1x256xf32> to vector<8x256xf32>
    %10 = arith.mulf %6, %9 : vector<8x256xf32>
    %11 = vector.broadcast %7 : vector<8x1xf32> to vector<8x256xf32>
    %12 = arith.mulf %11, %10 : vector<8x256xf32>
    %13 = arith.addf %5, %12 : vector<8x256xf32>
    %c16_i32 = arith.constant 16 : i32
    %14 = tpu.dynamic_rotate %0 by %c16_i32 dim 1 : vector<8x256xf32>, i32 -> vector<8x256xf32>
    %15 = vector.extract_strided_slice %1 {offsets = [0, 1], sizes = [8, 1], strides = [1, 1]} : vector<8x9xf32> to vector<8x1xf32>
    %16 = vector.extract_strided_slice %2 {offsets = [1, 0], sizes = [1, 256], strides = [1, 1]} : vector<9x256xf32> to vector<1x256xf32>
    %17 = vector.broadcast %16 : vector<1x256xf32> to vector<8x256xf32>
    %18 = arith.mulf %14, %17 : vector<8x256xf32>
    %19 = vector.broadcast %15 : vector<8x1xf32> to vector<8x256xf32>
    %20 = arith.mulf %19, %18 : vector<8x256xf32>
    %21 = arith.addf %13, %20 : vector<8x256xf32>
    %c15_i32 = arith.constant 15 : i32
    %22 = tpu.dynamic_rotate %0 by %c15_i32 dim 1 : vector<8x256xf32>, i32 -> vector<8x256xf32>
    %23 = vector.extract_strided_slice %1 {offsets = [0, 2], sizes = [8, 1], strides = [1, 1]} : vector<8x9xf32> to vector<8x1xf32>
    %24 = vector.extract_strided_slice %2 {offsets = [2, 0], sizes = [1, 256], strides = [1, 1]} : vector<9x256xf32> to vector<1x256xf32>
    %25 = vector.broadcast %24 : vector<1x256xf32> to vector<8x256xf32>
    %26 = arith.mulf %22, %25 : vector<8x256xf32>
    %27 = vector.broadcast %23 : vector<8x1xf32> to vector<8x256xf32>
    %28 = arith.mulf %27, %26 : vector<8x256xf32>
    %29 = arith.addf %21, %28 : vector<8x256xf32>
    %c1_i32 = arith.constant 1 : i32
    %30 = tpu.dynamic_rotate %0 by %c1_i32 dim 1 : vector<8x256xf32>, i32 -> vector<8x256xf32>
    %31 = vector.extract_strided_slice %1 {offsets = [0, 3], sizes = [8, 1], strides = [1, 1]} : vector<8x9xf32> to vector<8x1xf32>
    %32 = vector.extract_strided_slice %2 {offsets = [3, 0], sizes = [1, 256], strides = [1, 1]} : vector<9x256xf32> to vector<1x256xf32>
    %33 = vector.broadcast %32 : vector<1x256xf32> to vector<8x256xf32>
    %34 = arith.mulf %30, %33 : vector<8x256xf32>
    %35 = vector.broadcast %31 : vector<8x1xf32> to vector<8x256xf32>
    %36 = arith.mulf %35, %34 : vector<8x256xf32>
    %37 = arith.addf %29, %36 : vector<8x256xf32>
    %c255_i32 = arith.constant 255 : i32
    %38 = tpu.dynamic_rotate %0 by %c255_i32 dim 1 : vector<8x256xf32>, i32 -> vector<8x256xf32>
    %39 = vector.extract_strided_slice %1 {offsets = [0, 5], sizes = [8, 1], strides = [1, 1]} : vector<8x9xf32> to vector<8x1xf32>
    %40 = vector.extract_strided_slice %2 {offsets = [5, 0], sizes = [1, 256], strides = [1, 1]} : vector<9x256xf32> to vector<1x256xf32>
    %41 = vector.broadcast %40 : vector<1x256xf32> to vector<8x256xf32>
    %42 = arith.mulf %38, %41 : vector<8x256xf32>
    %43 = vector.broadcast %39 : vector<8x1xf32> to vector<8x256xf32>
    %44 = arith.mulf %43, %42 : vector<8x256xf32>
    %45 = arith.addf %37, %44 : vector<8x256xf32>
    %c241_i32 = arith.constant 241 : i32
    %46 = tpu.dynamic_rotate %0 by %c241_i32 dim 1 : vector<8x256xf32>, i32 -> vector<8x256xf32>
    %47 = vector.extract_strided_slice %1 {offsets = [0, 6], sizes = [8, 1], strides = [1, 1]} : vector<8x9xf32> to vector<8x1xf32>
    %48 = vector.extract_strided_slice %2 {offsets = [6, 0], sizes = [1, 256], strides = [1, 1]} : vector<9x256xf32> to vector<1x256xf32>
    %49 = vector.broadcast %48 : vector<1x256xf32> to vector<8x256xf32>
    %50 = arith.mulf %46, %49 : vector<8x256xf32>
    %51 = vector.broadcast %47 : vector<8x1xf32> to vector<8x256xf32>
    %52 = arith.mulf %51, %50 : vector<8x256xf32>
    %53 = arith.addf %45, %52 : vector<8x256xf32>
    %c240_i32 = arith.constant 240 : i32
    %54 = tpu.dynamic_rotate %0 by %c240_i32 dim 1 : vector<8x256xf32>, i32 -> vector<8x256xf32>
    %55 = vector.extract_strided_slice %1 {offsets = [0, 7], sizes = [8, 1], strides = [1, 1]} : vector<8x9xf32> to vector<8x1xf32>
    %56 = vector.extract_strided_slice %2 {offsets = [7, 0], sizes = [1, 256], strides = [1, 1]} : vector<9x256xf32> to vector<1x256xf32>
    %57 = vector.broadcast %56 : vector<1x256xf32> to vector<8x256xf32>
    %58 = arith.mulf %54, %57 : vector<8x256xf32>
    %59 = vector.broadcast %55 : vector<8x1xf32> to vector<8x256xf32>
    %60 = arith.mulf %59, %58 : vector<8x256xf32>
    %61 = arith.addf %53, %60 : vector<8x256xf32>
    %c239_i32 = arith.constant 239 : i32
    %62 = tpu.dynamic_rotate %0 by %c239_i32 dim 1 : vector<8x256xf32>, i32 -> vector<8x256xf32>
    %63 = vector.extract_strided_slice %1 {offsets = [0, 8], sizes = [8, 1], strides = [1, 1]} : vector<8x9xf32> to vector<8x1xf32>
    %64 = vector.extract_strided_slice %2 {offsets = [8, 0], sizes = [1, 256], strides = [1, 1]} : vector<9x256xf32> to vector<1x256xf32>
    %65 = vector.broadcast %64 : vector<1x256xf32> to vector<8x256xf32>
    %66 = arith.mulf %62, %65 : vector<8x256xf32>
    %67 = vector.broadcast %63 : vector<8x1xf32> to vector<8x256xf32>
    %68 = arith.mulf %67, %66 : vector<8x256xf32>
    %69 = arith.addf %61, %68 : vector<8x256xf32>
    %c0_5 = arith.constant 0 : index
    %c0_6 = arith.constant 0 : index
    %70 = vector.load %arg4[%c0_5, %c0_6] : memref<8x1xf32, #tpu.memory_space<vmem>>, vector<8x1xf32>
    %71 = vector.broadcast %70 : vector<8x1xf32> to vector<8x256xf32>
    %72 = arith.addf %69, %71 : vector<8x256xf32>
    %cst = arith.constant 0.000000e+00 : f32
    %73 = vector.broadcast %cst : f32 to vector<8x256xf32>
    %74 = arith.maximumf %72, %73 : vector<8x256xf32>
    %c0_7 = arith.constant 0 : index
    %c0_8 = arith.constant 0 : index
    %75 = vector.load %arg5[%c0_7, %c0_8] : memref<16x8xf32, #tpu.memory_space<vmem>>, vector<16x8xf32>
    %76 = arith.truncf %75 : vector<16x8xf32> to vector<16x8xbf16>
    %77 = arith.truncf %74 : vector<8x256xf32> to vector<8x256xbf16>
    %cst_9 = arith.constant dense<0.000000e+00> : vector<16x256xf32>
    %78 = tpu.matmul %76, %77, %cst_9 {dimension_numbers = #tpu.dot_dimension_numbers<[1], [0], [0], [1], [0, 0, 1, 1], [], []>} : vector<16x8xbf16>, vector<8x256xbf16>, vector<16x256xf32> -> vector<16x256xf32>
    %c0_10 = arith.constant 0 : index
    %c0_11 = arith.constant 0 : index
    %79 = vector.load %arg6[%c0_10, %c0_11] : memref<16x1xf32, #tpu.memory_space<vmem>>, vector<16x1xf32>
    %80 = vector.broadcast %79 : vector<16x1xf32> to vector<16x256xf32>
    %81 = arith.addf %78, %80 : vector<16x256xf32>
    %cst_12 = arith.constant 0.000000e+00 : f32
    %82 = vector.broadcast %cst_12 : f32 to vector<16x256xf32>
    %83 = arith.maximumf %81, %82 : vector<16x256xf32>
    %c0_13 = arith.constant 0 : index
    %c0_14 = arith.constant 0 : index
    %84 = vector.load %arg7[%c0_13, %c0_14] : memref<16x256xf32, #tpu.memory_space<vmem>>, vector<16x256xf32>
    tpu.vector_store %arg7[%c0_13, %c0_14], %83 {strides = array<i32>} : memref<16x256xf32, #tpu.memory_space<vmem>>, vector<16x256xf32>,
    return
  }
  func.func @transform_0(%arg0: i32) -> (i32, i32) {
    %c0_i32 = arith.constant 0 : i32
    %c0_i32_0 = arith.constant 0 : i32
    return %arg0, %c0_i32 : i32, i32
  }
  func.func @transform_1(%arg0: i32) -> (i32, i32) {
    %c0_i32 = arith.constant 0 : i32
    %c0_i32_0 = arith.constant 0 : i32
    %c0_i32_1 = arith.constant 0 : i32
    return %c0_i32, %c0_i32_0 : i32, i32
  }
  func.func @transform_2(%arg0: i32) -> (i32, i32) {
    %c0_i32 = arith.constant 0 : i32
    %c0_i32_0 = arith.constant 0 : i32
    %c0_i32_1 = arith.constant 0 : i32
    return %c0_i32, %c0_i32_0 : i32, i32
  }
  func.func @transform_3(%arg0: i32) -> (i32, i32) {
    %c0_i32 = arith.constant 0 : i32
    %c0_i32_0 = arith.constant 0 : i32
    %c0_i32_1 = arith.constant 0 : i32
    return %c0_i32, %c0_i32_0 : i32, i32
  }
  func.func @transform_4(%arg0: i32) -> (i32, i32) {
    %c0_i32 = arith.constant 0 : i32
    %c0_i32_0 = arith.constant 0 : i32
    %c0_i32_1 = arith.constant 0 : i32
    return %c0_i32, %c0_i32_0 : i32, i32
  }
  func.func @transform_5(%arg0: i32) -> (i32, i32) {
    %c0_i32 = arith.constant 0 : i32
    %c0_i32_0 = arith.constant 0 : i32
    %c0_i32_1 = arith.constant 0 : i32
    return %c0_i32, %c0_i32_0 : i32, i32
  }
  func.func @transform_6(%arg0: i32) -> (i32, i32) {
    %c0_i32 = arith.constant 0 : i32
    %c0_i32_0 = arith.constant 0 : i32
    return %arg0, %c0_i32 : i32, i32
  }
}

</mosaic_0001>

<bundles_post_ra>
// kernel: tpu_custom_call.1
= control target key start
LH: loop header
LB: loop body
LE: loop exit
PB: predicated region body
PF: predicated region fallthrough
CT: control target
= control target key end

     0   :  { %11 = vsyncpa [#allocation3], 0  ;;  %s618_s0 = inlined_call_operand.vmem [shape: f32[8,256], index: 0, kind: input, shape index: {}]   ;;  %s619_s1 = inlined_call_operand.hbm [shape: f32[8,9], index: 1, kind: input, shape index: {}]   ;;  %s620_s2 = inlined_call_operand.vmem [shape: f32[9,256], index: 2, kind: input, shape index: {}]   ;;  %s621_s3 = inlined_call_operand.vmem [shape: f32[8,1], index: 3, kind: input, shape index: {}]   ;;  %s622_s4 = inlined_call_operand.vmem [shape: f32[16,8], index: 4, kind: input, shape index: {}]   ;;  %s623_s5 = inlined_call_operand.vmem [shape: f32[16,1], index: 5, kind: input, shape index: {}]   ;;  %s624_s6 = inlined_call_operand.hbm [shape: f32[16,256], index: 6, kind: output, shape index: {}]  }
   0x1   :  { %12 = vsyncpa [#allocation4], 0  ;;  %s438_s21 = smov [#allocation2]  }
   0x2   :  { %s21_s22 = sshll.u32 %s438_s21, 4  ;;  %s22_s22 = int_to_ptr.vmem [resolvable:$true] %s21_s22 }
   0x3   :  { %s402_s23 = scalar_lea.vmem %s22_s22, 128  ;;  %p407_p1 = scmp.lt.s32.totalorder %s22_s22, %s22_s22 }
   0x4   :  { %p403_p0 = scmp.ne.s32.totalorder %s22_s22, %s402_s23  ;;  %p408_p2 = scmp.lt.s32.totalorder %s402_s23, %s402_s23 }
   0x6   :  { %p409_p3 = por %p408_p2, %p407_p1 }
   0x8   :  { %p410_p4 = pnand %p409_p3, %p403_p0 }
   0xa   :  { %413 = shalt.err (!%p410_p4)
}
   0xb   :  { %24 = dma.hbm_to_vmem [thread:$0]  %s619_s1, 128, %s22_s22, [#allocation3]  }
   0xc   :  { %434 = dma.done.wait [#allocation3], 128  }
   0xd   :  { %435 = vsyncadd [#allocation3], 4294967168  ;;  %v439_v0 = vmov 4   ;;  %v440_v1 = vmov 1   ;;  %v441_v2 = vmov 0   ;;  %v39_v3 = vld [vmem:[#allocation2] sm:$0xff]  ;;  %v55_v23 = vlaneseq }
   0xe   :  { %383 = vset.pattern.permute.xlu0 %v439_v0  ;;  %385 = vset.pattern.permute.xlu1 %v440_v1  ;;  %v499_v4 = vld [vmem:[%s618_s0] sm:$0xff]  ;;  %s442_s28 = smov 17   ;;  %v505_v5 = vld [vmem:[%s618_s0 + $0x8] sm:$0xff]  ;;  %s443_s30 = smov 16   ;;  %v444_v6 = vmov 2   ;;  %v446_v7 = vmov 3  }
   0xf   :  { %323 = vmatprep.mubr.bf16.mxu0 %v441_v2  ;;  %46 = vperm.xlu0 %383, %v39_v3   ;;  %s445_s7 = smov 15   ;;  %v447_v8 = vmov 5   ;;  %s448_s0 = smov 1   ;;  %v449_v9 = vmov 6   ;;  %v451_v10 = vmov 7   ;;  %v452_v11 = vmov 8  }
  0x10   :  { %51 = vrot.lane.b32.xlu1 %v499_v4, %s442_s28  ;;  %s450_s8 = smov 127   ;;  %s453_s9 = smov 113   ;;  %v253_v12 = vld [vmem:[%s621_s3] sm:$0xff]  ;;  %v269_v14 = vld [vmem:[%s623_s5 + $0x8] sm:$0xff]  ;;  %v535_v25 = vshrl.u32 %v55_v23, 7  ;;  %v537_v28 = vand.u32 127, %v55_v23 }
  0x11   :  { %s454_s12 = smov 112   ;;  %s455_s13 = smov 111   ;;  %v268_v13 = vld [vmem:[%s623_s5] sm:$0xff]  ;;  %v549_v34 = vld [vmem:[%s620_s2 + $0x8] sm:$0xff]  ;;  %vm284_vm8 = vcmask 1043456   ;;  %vm280_vm9 = vcmask 64512  }
  0x12   :  { %v62_v29 = vsub.s32 0, %v535_v25  ;;  %v543_v31 = vld [vmem:[%s620_s2] sm:$0xff]  ;;  %v87_v32 = vsub.s32 1, %v535_v25  ;;  %v112_v35 = vsub.s32 2, %v535_v25  ;;  %vm57_vm0 = vcmp.lt.s32.totalorder %v537_v28, 17 }
  0x13   :  { %384 = vset.pattern.permute.xlu0 %v441_v2  ;;  %v137_v36 = vsub.s32 3, %v535_v25  ;;  %vm82_vm1 = vcmp.lt.s32.totalorder %v537_v28, 16  ;;  %v162_v39 = vsub.s32 5, %v535_v25  ;;  %vm107_vm2 = vcmp.lt.s32.totalorder %v537_v28, 15 }
  0x14   :  { %53 = vrot.lane.b32.xlu1 %v505_v5, %s442_s28  ;;  %71 = vperm.xlu0 %384, %v39_v3   ;;  %v63_v37 = vrot.slane %v543_v31, %v62_v29  ;;  %v67_v40 = vrot.slane %v549_v34, %v62_v29  ;;  %v88_v41 = vrot.slane %v543_v31, %v87_v32  ;;  %vm132_vm3 = vcmp.lt.s32.totalorder %v537_v28, 1 }
  0x15   :  { %v92_v42 = vrot.slane %v549_v34, %v87_v32  ;;  %v113_v46 = vrot.slane %v543_v31, %v112_v35  ;;  %v117_v47 = vrot.slane %v549_v34, %v112_v35  ;;  %v138_v50 = vrot.slane %v543_v31, %v137_v36 }
  0x16   :  { %v142_v51 = vrot.slane %v549_v34, %v137_v36  ;;  %vm157_vm4 = vcmp.lt.s32.totalorder %v537_v28, 127  ;;  %v163_v53 = vrot.slane %v543_v31, %v162_v39  ;;  %v187_v54 = vsub.s32 6, %v535_v25 }
  0x17   :  { %v167_v62 = vrot.slane %v549_v34, %v162_v39  ;;  %vm182_vm5 = vcmp.lt.s32.totalorder %v537_v28, 113  ;;  %vm207_vm6 = vcmp.lt.s32.totalorder %v537_v28, 112  ;;  %vm232_vm7 = vcmp.lt.s32.totalorder %v537_v28, 111 }
  0x18   :  { %96 = vperm.xlu1 %385, %v39_v3   ;;  %78 = vrot.lane.b32.xlu0 %v499_v4, %s443_s30 }
  0x19   :  { %386 = vset.pattern.permute.xlu0 %v444_v6 }
  0x1c   :  { %80 = vrot.lane.b32.xlu1 %v505_v5, %s443_s30  ;;  %121 = vperm.xlu0 %386, %v39_v3  }
  0x1d   :  { %393 = vset.pattern.permute.xlu1 %v441_v2 }
  0x20   :  { %103 = vrot.lane.b32.xlu1 %v499_v4, %s445_s7  ;;  %387 = vset.pattern.permute.xlu0 %v446_v7 }
  0x21   :  { %146 = vperm.xlu0 %387, %v39_v3  }
  0x24   :  { %105 = vrot.lane.b32.xlu1 %v505_v5, %s445_s7 }
  0x25   :  { %388 = vset.pattern.permute.xlu0 %v447_v8 }
  0x26   :  { %171 = vperm.xlu0 %388, %v39_v3  }
  0x28   :  { %128 = vrot.lane.b32.xlu1 %v499_v4, %s448_s0 }
  0x2a   :  { %389 = vset.pattern.permute.xlu0 %v449_v9 }
  0x2b   :  { %196 = vperm.xlu0 %389, %v39_v3  }
  0x2c   :  { %130 = vrot.lane.b32.xlu1 %v505_v5, %s448_s0 }
  0x2f   :  { %390 = vset.pattern.permute.xlu0 %v451_v10  ;;  %v188_v10 = vrot.slane %v543_v31, %v187_v54 }
  0x30   :  { %153 = vrot.lane.b32.xlu1 %v499_v4, %s450_s8  ;;  %221 = vperm.xlu0 %390, %v39_v3  }
  0x34   :  { %155 = vrot.lane.b32.xlu1 %v505_v5, %s450_s8  ;;  %391 = vset.pattern.permute.xlu0 %v452_v11  ;;  %v192_v11 = vrot.slane %v549_v34, %v187_v54 }
  0x35   :  { %246 = vperm.xlu0 %391, %v39_v3  }
  0x38   :  { %178 = vrot.lane.b32.xlu1 %v499_v4, %s453_s9 }
  0x39   :  { %392 = vset.pattern.permute.xlu0 %v441_v2 }
  0x3a   :  { %256 = vperm.xlu0 %392, %v253_v12  }
  0x3c   :  { %180 = vrot.lane.b32.xlu1 %v505_v5, %s453_s9 }
  0x40   :  { %203 = vrot.lane.b32.xlu1 %v499_v4, %s454_s12 }
  0x44   :  { %205 = vrot.lane.b32.xlu1 %v505_v5, %s454_s12 }
  0x48   :  { %228 = vrot.lane.b32.xlu1 %v499_v4, %s455_s13 }
  0x4c   :  { %230 = vrot.lane.b32.xlu1 %v505_v5, %s455_s13 }
  0x50   :  { %272 = vperm.xlu1 %393, %v268_v13  }
  0x54   :  { %277 = vperm.xlu1 %393, %v269_v14  }
  0x82   :  { %v52_v15 = vpop.permute.xlu1 %51 }
  0x86   :  { %v54_v16 = vpop.permute.xlu1 %53 }
  0x87   :  { %v58_v44 = vsel %vm57_vm0, %v52_v15, %v54_v16  ;;  %v59_v45 = vsel %vm57_vm0, %v54_v16, %v52_v15 }
  0x88   :  { %v68_v55 = vmul.f32 %v63_v37, %v59_v45  ;;  %v69_v56 = vmul.f32 %v67_v40, %v58_v44 }
  0x8a   :  { %v47_v22 = vpop.permute.xlu0 %46 }
  0x8b   :  { %v49_v63 = vmul.f32 %v47_v22, %v499_v4  ;;  %v50_v0 = vmul.f32 %v47_v22, %v505_v5  ;;  %v212_v4 = vsub.s32 7, %v535_v25 }
  0x8d   :  { %v213_v29 = vrot.slane %v543_v31, %v212_v4 }
  0x8f   :  { %v72_v26 = vpop.permute.xlu0 %71 }
  0x90   :  { %v74_v1 = vmul.f32 %v72_v26, %v68_v55  ;;  %v75_v2 = vmul.f32 %v72_v26, %v69_v56 }
  0x92   :  { %v76_v16 = vadd.f32 %v74_v1, %v49_v63 }
  0x93   :  { %v533_v17 = vpop.permute.xlu1 %96  ;;  %v79_v30 = vpop.permute.xlu0 %78 }
  0x97   :  { %v81_v18 = vpop.permute.xlu1 %80  ;;  %v122_v38 = vpop.permute.xlu0 %121 }
  0x98   :  { %v83_v48 = vsel %vm82_vm1, %v79_v30, %v81_v18  ;;  %v84_v49 = vsel %vm82_vm1, %v81_v18, %v79_v30  ;;  %v77_v18 = vadd.f32 %v75_v2, %v50_v0  ;;  %v217_v30 = vrot.slane %v549_v34, %v212_v4  ;;  %v263_v4 = vld [vmem:[%s622_s4] sm:$0xff] }
  0x99   :  { %v93_v60 = vmul.f32 %v88_v41, %v84_v49  ;;  %v94_v61 = vmul.f32 %v92_v42, %v83_v48 }
  0x9b   :  { %v104_v19 = vpop.permute.xlu1 %103  ;;  %v99_v5 = vmul.f32 %v533_v17, %v93_v60  ;;  %v100_v13 = vmul.f32 %v533_v17, %v94_v61 }
  0x9c   :  { %v147_v52 = vpop.permute.xlu0 %146 }
  0x9d   :  { %v101_v32 = vadd.f32 %v99_v5, %v76_v16  ;;  %v264_v5 = vld [vmem:[%s622_s4 + $0x8] sm:$0xff]  ;;  %s456_s4 = smov [#allocation5]  }
  0x9e   :  { %v265_v16 = vpack.c.bf16 %v264_v5, %v263_v4  ;;  %s347_s27 = sshll.u32 %s456_s4, 4  ;;  %s348_s27 = int_to_ptr.vmem [resolvable:$true] %s347_s27 }
  0x9f   :  { %v106_v20 = vpop.permute.xlu1 %105  ;;  %s414_s28 = scalar_lea.vmem %s348_s27, 512  ;;  %p419_p6 = scmp.lt.s32.totalorder %s348_s27, %s348_s27 }
  0xa0   :  { %v108_v57 = vsel %vm107_vm2, %v104_v19, %v106_v20  ;;  %v109_v58 = vsel %vm107_vm2, %v106_v20, %v104_v19  ;;  %p415_p5 = scmp.ne.s32.totalorder %s348_s27, %s414_s28  ;;  %p420_p7 = scmp.lt.s32.totalorder %s414_s28, %s414_s28 }
  0xa1   :  { %v118_v3 = vmul.f32 %v113_v46, %v109_v58  ;;  %v119_v6 = vmul.f32 %v117_v47, %v108_v57  ;;  %v172_v9 = vpop.permute.xlu0 %171 }
  0xa2   :  { %p421_p8 = por %p420_p7, %p419_p6 }
  0xa3   :  { %v129_v21 = vpop.permute.xlu1 %128  ;;  %v125_v22 = vmul.f32 %v122_v38, %v119_v6 }
  0xa4   :  { %p422_p9 = pnand %p421_p8, %p415_p5 }
  0xa6   :  { %v197_v25 = vpop.permute.xlu0 %196 }
  0xa7   :  { %v131_v24 = vpop.permute.xlu1 %130 }
  0xa8   :  { %v133_v7 = vsel %vm132_vm3, %v129_v21, %v131_v24  ;;  %v134_v8 = vsel %vm132_vm3, %v131_v24, %v129_v21  ;;  %v124_v21 = vmul.f32 %v122_v38, %v118_v3 }
  0xa9   :  { %v143_v19 = vmul.f32 %v138_v50, %v134_v8  ;;  %v144_v20 = vmul.f32 %v142_v51, %v133_v7  ;;  %v359_v51 = vld [vmem:[%s620_s2 + $0x10] ss:$0 sm:$0xff] }
  0xaa   :  { %v126_v41 = vadd.f32 %v124_v21, %v101_v32 }
  0xab   :  { %v154_v27 = vpop.permute.xlu1 %153  ;;  %v149_v37 = vmul.f32 %v147_v52, %v143_v19  ;;  %v150_v38 = vmul.f32 %v147_v52, %v144_v20  ;;  %v360_v52 = vld [vmem:[%s620_s2 + $0x18] ss:$0 sm:$0xff] }
  0xad   :  { %v151_v47 = vadd.f32 %v149_v37, %v126_v41 }
  0xaf   :  { %v156_v33 = vpop.permute.xlu1 %155 }
  0xb0   :  { %v158_v14 = vsel %vm157_vm4, %v154_v27, %v156_v33  ;;  %v159_v15 = vsel %vm157_vm4, %v156_v33, %v154_v27  ;;  %v102_v33 = vadd.f32 %v100_v13, %v77_v18 }
  0xb1   :  { %v168_v17 = vmul.f32 %v163_v53, %v158_v14  ;;  %v169_v26 = vmul.f32 %v167_v62, %v159_v15 }
  0xb2   :  { %v127_v42 = vadd.f32 %v125_v22, %v102_v33 }
  0xb3   :  { %v179_v43 = vpop.permute.xlu1 %178  ;;  %v174_v44 = vmul.f32 %v172_v9, %v168_v17  ;;  %v175_v31 = vmul.f32 %v172_v9, %v169_v26 }
  0xb4   :  { %v152_v48 = vadd.f32 %v150_v38, %v127_v42 }
  0xb5   :  { %v176_v54 = vadd.f32 %v174_v44, %v151_v47 }
  0xb6   :  { %v177_v55 = vadd.f32 %v175_v31, %v152_v48 }
  0xb7   :  { %v181_v59 = vpop.permute.xlu1 %180 }
  0xb8   :  { %v183_v23 = vsel %vm182_vm5, %v179_v43, %v181_v59  ;;  %v184_v24 = vsel %vm182_vm5, %v181_v59, %v179_v43  ;;  %v222_v43 = vpop.permute.xlu0 %221 }
  0xb9   :  { %v193_v39 = vmul.f32 %v188_v10, %v183_v23  ;;  %v194_v40 = vmul.f32 %v192_v11, %v184_v24 }
  0xbb   :  { %v204_v12 = vpop.permute.xlu1 %203  ;;  %v199_v49 = vmul.f32 %v197_v25, %v193_v39  ;;  %v200_v50 = vmul.f32 %v197_v25, %v194_v40 }
  0xbc   :  { %v247_v53 = vpop.permute.xlu0 %246 }
  0xbd   :  { %v201_v60 = vadd.f32 %v199_v49, %v176_v54  ;;  %v202_v61 = vadd.f32 %v200_v50, %v177_v55 }
  0xbf   :  { %v206_v27 = vpop.permute.xlu1 %205 }
  0xc0   :  { %v208_v35 = vsel %vm207_vm6, %v204_v12, %v206_v27  ;;  %v209_v36 = vsel %vm207_vm6, %v206_v27, %v204_v12  ;;  %v257_v6 = vpop.permute.xlu0 %256 }
  0xc1   :  { %v218_v45 = vmul.f32 %v213_v29, %v208_v35  ;;  %v219_v34 = vmul.f32 %v217_v30, %v209_v36 }
  0xc3   :  { %v229_v46 = vpop.permute.xlu1 %228  ;;  %v224_v56 = vmul.f32 %v222_v43, %v218_v45  ;;  %v225_v57 = vmul.f32 %v222_v43, %v219_v34 }
  0xc5   :  { %v226_v0 = vadd.f32 %v224_v56, %v201_v60  ;;  %v227_v1 = vadd.f32 %v225_v57, %v202_v61 }
  0xc7   :  { %v231_v58 = vpop.permute.xlu1 %230 }
  0xc8   :  { %v233_v59 = vsel %vm232_vm7, %v229_v46, %v231_v58  ;;  %v234_v28 = vsel %vm232_vm7, %v231_v58, %v229_v46 }
  0xc9   :  { %v243_v62 = vmul.f32 %v359_v51, %v233_v59  ;;  %v244_v63 = vmul.f32 %v360_v52, %v234_v28 }
  0xcb   :  { %v249_v2 = vmul.f32 %v247_v53, %v243_v62  ;;  %v250_v3 = vmul.f32 %v247_v53, %v244_v63  ;;  %v273_v18 = vpop.permute.xlu1 %272 }
  0xcd   :  { %v251_v7 = vadd.f32 %v249_v2, %v226_v0  ;;  %v252_v8 = vadd.f32 %v250_v3, %v227_v1 }
  0xcf   :  { %v259_v9 = vadd.f32 %v257_v6, %v251_v7  ;;  %v260_v10 = vadd.f32 %v257_v6, %v252_v8  ;;  %v278_v24 = vpop.permute.xlu1 %277 }
  0xd1   :  { %v261_v11 = vmax.f32 %v259_v9, 0.0  ;;  %v262_v12 = vmax.f32 %v260_v10, 0.0 }
  0xd3   :  { %v266_v13 = vpack.c.bf16 %v261_v11, %v261_v11  ;;  %v267_v14 = vpack.c.bf16 %v262_v12, %v262_v12 }
  0xd5   :  { %361 = vmatprep.subr.msk.bf16.mxu0 %vm284_vm8, %v267_v14  ;;  %v286_v15 = vsel %vm284_vm8, %v266_v13, 0 }
  0xd6   :  { %306 = vmatpush1.bf16.msra.mxu0 %v286_v15 }
  0xd9   :  { %362 = vmatmul.mubr.msk.bf16.vlgmr.msra.gmra.mxu0 %vm280_vm9, %v265_v16 }
 0x199   :  { %v325_v19 = vpop.f32.mrf.mxu0 }
 0x19a   :  { %v326_v20 = vadd.f32 %v325_v19, %v273_v18 }
 0x19b   :  { %v327_v21 = vpop.f32.mrf.mxu0 }
 0x19c   :  { %v334_v22 = vmax.f32 %v326_v20, 0.0  ;;  %v328_v23 = vadd.f32 %v327_v21, %v273_v18 }
 0x19d   :  { %v329_v25 = vpop.f32.mrf.mxu0 }
 0x19e   :  { %338 = vst [vmem:[#allocation5] sm:$0xff] %v334_v22  ;;  %v335_v17 = vmax.f32 %v328_v23, 0.0  ;;  %v330_v26 = vadd.f32 %v329_v25, %v278_v24 }
 0x19f   :  { %v331_v29 = vpop.f32.mrf.mxu0 }
 0x1a0   :  { %339 = vst [vmem:[#allocation5 + $0x8] sm:$0xff] %v335_v17  ;;  %v336_v30 = vmax.f32 %v330_v26, 0.0  ;;  %v332_v27 = vadd.f32 %v331_v29, %v278_v24 }
 0x1a2   :  { %340 = vst [vmem:[#allocation5 + $0x10] sm:$0xff] %v336_v30  ;;  %v337_v32 = vmax.f32 %v332_v27, 0.0 }
 0x1a4   :  { %341 = vst [vmem:[#allocation5 + $0x18] sm:$0xff] %v337_v32 }
 0x1a5   :  { %425 = shalt.err (!%p422_p9)
}
 0x1a6   :  { %s457_s29 = smov 256  }
 0x1a7   :  { %353 = dma.vmem_to_hbm [thread:$0]  %s348_s27, 512, %s624_s6, [#allocation4], %s457_s29, %s457_s29, %s443_s30  }
 0x1a8   :  { %436 = dma.done.wait [#allocation4], 512  }
 0x1a9   :  { %437 = vsyncadd [#allocation4], 4294966784 }
 0x1aa   :  { %357 = vsyncpa [#allocation3], 1 }
 0x1ab   :  { %358 = vsyncpa [#allocation4], 1 }

</bundles_post_ra>
